<compile_context>
chip_gen: v5e
topology: v5e:2x2
jax: 0.10.0
libtpu: 0.0.40
codegen_flags: <defaults>
</compile_context>

<pallas_src>
import jax
import jax.numpy as jnp
from jax.experimental import pallas as pl
from jax.experimental.pallas import tpu as pltpu


# --------------------------------------------------------------------------
# Fused kernel: linear score -> online softmax over dim 0 -> weighted pooling
# Grid: (split, row_block)   split = "parallel", row_block = "arbitrary"
# Each split emits its partial softmax state (m, l, acc).
# --------------------------------------------------------------------------
def attention_pool_kernel(x_ref, w_ref, m_out, l_out, acc_out,
                          m_sc, l_sc, acc_sc):
    j = pl.program_id(1)

    @pl.when(j == 0)
    def _():
        m_sc[...] = jnp.full_like(m_sc, -jnp.inf)
        l_sc[...] = jnp.zeros_like(l_sc)
        acc_sc[...] = jnp.zeros_like(acc_sc)

    x = x_ref[...]                                           # (ts, D), native dtype

    # scores for this row tile (MXU), f32 accumulate: (ts, D) @ (D, 1) -> (ts, 1)
    s = jnp.dot(x, w_ref[...], preferred_element_type=jnp.float32)

    # online softmax over the sequence axis (dim 0) -- all stats in f32
    m_prev = m_sc[...]                                       # (1, 1)
    m_new = jnp.maximum(m_prev, jnp.max(s, axis=0, keepdims=True))
    alpha = jnp.exp(m_prev - m_new)                          # (1, 1)
    p = jnp.exp(s - m_new)                                   # (ts, 1) f32

    l_sc[...] = alpha * l_sc[...] + jnp.sum(p, axis=0, keepdims=True)

    # weighted row-sum on the MXU: contract dim 0 of p with dim 0 of x
    #   (ts, 1) x (ts, D) -> (1, D)   (lane-dense output), f32 accumulation
    acc_sc[...] = alpha * acc_sc[...] + jax.lax.dot_general(
        p.astype(x.dtype), x, (((0,), (0,)), ((), ())),
        preferred_element_type=jnp.float32)

    m_sc[...] = m_new

    @pl.when(j == pl.num_programs(1) - 1)
    def _():
        m_out[0] = m_sc[...]
        l_out[0] = l_sc[...]
        acc_out[0] = acc_sc[...]


# --------------------------------------------------------------------------
# Tiling selection: sublane-aligned row tile ~8 MiB per pipeline buffer,
# optional 2-way sequence split (uses both TensorCores on v7x).
# --------------------------------------------------------------------------
def _select_tiling(S, D, itemsize, row_tile=None, num_splits=None):
    sublane = {4: 8, 2: 16, 1: 32}.get(itemsize, 8)

    if num_splits is None:
        num_splits = 2
    if num_splits > 1 and (S % num_splits != 0
                           or (S // num_splits) % sublane != 0):
        num_splits = 1
    rows = S // num_splits

    if row_tile is None:
        # target ~8 MiB per x buffer (double-buffered -> 16 MiB, fits v7x too)
        target_rows = max(sublane, (8 << 20) // max(1, D * itemsize))
        row_tile = target_rows

    if rows % sublane == 0:
        t = min(row_tile, rows)
        t = (t // sublane) * sublane
        while t >= sublane and rows % t != 0:
            t -= sublane
    else:
        t = 0

    if t < sublane:
        # ragged / tiny S: single full-extent block (always a legal BlockSpec)
        # TODO(synk): ragged S with large tiles would need a masked tail path.
        return 1, S
    return num_splits, t


# --------------------------------------------------------------------------
# Wrapper
#   x: (S, D) sequence features, w: (1, D) nn.Linear weight, b: (1,) bias
#   returns pooled vector of shape (D,)
# --------------------------------------------------------------------------
def attention_pooling(x, w, b=None, *, row_tile=None, num_splits=None):
    # NOTE: the linear bias is intentionally unused -- softmax over dim 0 is
    # shift-invariant, so a constant added to every score cannot change the
    # output.  It is accepted only for API parity with nn.Linear.
    del b

    S, D = x.shape
    itemsize = jnp.dtype(x.dtype).itemsize
    num_splits, row_tile = _select_tiling(S, D, itemsize, row_tile, num_splits)
    rows_per_split = S // num_splits
    blocks_per_split = rows_per_split // row_tile

    # nn.Linear weight is (1, D); reshape (not transpose) to a (D, 1) column,
    # matched to x's dtype so the MXU sees native-width operands.
    w_col = w.reshape(D, 1).astype(x.dtype)

    x_tile_bytes = row_tile * D * itemsize
    vmem_limit = int(min(max(3 * x_tile_bytes + (2 << 20), 16 << 20), 60 << 20))

    cost = pl.CostEstimate(
        flops=4 * S * D,
        transcendentals=S,
        bytes_accessed=S * D * itemsize + D * itemsize
                       + num_splits * (D + 2) * 4,
    )

    m_part, l_part, acc_part = pl.pallas_call(
        attention_pool_kernel,
        out_shape=(
            jax.ShapeDtypeStruct((num_splits, 1, 1), jnp.float32),   # partial m
            jax.ShapeDtypeStruct((num_splits, 1, 1), jnp.float32),   # partial l
            jax.ShapeDtypeStruct((num_splits, 1, D), jnp.float32),   # partial acc
        ),
        grid_spec=pltpu.PrefetchScalarGridSpec(
            num_scalar_prefetch=0,
            grid=(num_splits, blocks_per_split),
            in_specs=[
                pl.BlockSpec((row_tile, D),
                             lambda i, j: (i * blocks_per_split + j, 0)),
                pl.BlockSpec((D, 1), lambda i, j: (0, 0)),
            ],
            out_specs=[
                pl.BlockSpec((1, 1, 1), lambda i, j: (i, 0, 0)),
                pl.BlockSpec((1, 1, 1), lambda i, j: (i, 0, 0)),
                pl.BlockSpec((1, 1, D), lambda i, j: (i, 0, 0)),
            ],
            scratch_shapes=[
                pltpu.VMEM((1, 1), jnp.float32),   # running max m
                pltpu.VMEM((1, 1), jnp.float32),   # running denom l
                pltpu.VMEM((1, D), jnp.float32),   # running weighted sum
            ],
        ),
        compiler_params=pltpu.CompilerParams(
            # split axis independent -> parallel (both TCs on v7x);
            # row-block axis is the softmax/pooling reduction -> arbitrary
            dimension_semantics=("parallel", "arbitrary"),
            vmem_limit_bytes=vmem_limit,
        ),
        cost_estimate=cost,
    )(x, w_col)

    # Flash-split-K style combine of the per-split softmax states (exact, f32).
    m_p = m_part[:, 0, 0]                      # (ns,)
    l_p = l_part[:, 0, 0]                      # (ns,)
    acc_p = acc_part[:, 0, :]                  # (ns, D)

    m_glob = jnp.max(m_p)
    scale = jnp.exp(m_p - m_glob)              # (ns,)
    l_glob = jnp.sum(scale * l_p)
    acc_glob = jnp.sum(scale[:, None] * acc_p, axis=0)   # (D,)
    return (acc_glob / l_glob).astype(x.dtype)


# --------------------------------------------------------------------------
# Pure-JAX reference (mirrors the PyTorch forward exactly)
# --------------------------------------------------------------------------
def reference_forward(x, w, b):
    scores = x @ w.T + b                       # (S, 1)
    att = jax.nn.softmax(scores, axis=0)       # softmax over dim 0
    return jnp.sum(att * x, axis=0)            # (D,)


if __name__ == "__main__":
    # TODO(synk): the kernel assumes 2-D input (seq, features); batched 3-D
    # input (seq, batch, dim) would need an extra batched grid axis.
    S = 64          # sequence length (dim 0, pooled over)
    D = 32          # input_dim / hidden

    key = jax.random.PRNGKey(0)
    kx, kw, kb = jax.random.split(key, 3)

    x = jax.random.normal(kx, (S, D), jnp.float32)

    # nn.Linear(D, 1) default-style init (uniform in +-1/sqrt(fan_in))
    bound = 1.0 / (D ** 0.5)
    w = jax.random.uniform(kw, (1, D), jnp.float32, -bound, bound)
    b = jax.random.uniform(kb, (1,), jnp.float32, -bound, bound)

    out = attention_pooling(x, w, b)
    out = jax.block_until_ready(out)

    ref = reference_forward(x, w, b)
    assert out.shape == (D,)
    assert jnp.allclose(out, ref, atol=2e-3, rtol=2e-3), "mismatch vs reference"

    print("KERNEL_OK")
</pallas_src>

<mosaic_0001>
module attributes {stable_mosaic.version = 11 : i64} {
  func.func @attention_pool_kernel(%arg0: i32, %arg1: i32, %arg2: memref<32x32xf32, #tpu.memory_space<vmem>>, %arg3: memref<32x1xf32, #tpu.memory_space<vmem>>, %arg4: memref<1x1x1xf32, #tpu.memory_space<vmem>>, %arg5: memref<1x1x1xf32, #tpu.memory_space<vmem>>, %arg6: memref<1x1x32xf32, #tpu.memory_space<vmem>>, %arg7: memref<1x1xf32, #tpu.memory_space<vmem>>, %arg8: memref<1x1xf32, #tpu.memory_space<vmem>>, %arg9: memref<1x32xf32, #tpu.memory_space<vmem>>) attributes {dimension_semantics = [#tpu.dimension_semantics<parallel>, #tpu.dimension_semantics<arbitrary>], iteration_bounds = array<i64: 2, 1>, scalar_prefetch = 0 : i64, scratch_operands = 3 : i64, tpu.core_type = #tpu.core_type<tc>, window_params = [{transform_indices = @transform_0, window_bounds = array<i64: 32, 32>}, {pipeline_mode = #tpu.pipeline_mode<synchronous>, transform_indices = @transform_1, window_bounds = array<i64: 32, 1>}, {transform_indices = @transform_2, window_bounds = array<i64: 1, 1, 1>}, {transform_indices = @transform_3, window_bounds = array<i64: 1, 1, 1>}, {transform_indices = @transform_4, window_bounds = array<i64: 1, 1, 32>}]} {
    %c0_i32 = arith.constant 0 : i32
    %0 = arith.cmpi eq, %arg1, %c0_i32 : i32
    %1 = arith.extui %0 : i1 to i32
    %c0_i32_0 = arith.constant 0 : i32
    %2 = arith.cmpi ne, %1, %c0_i32_0 : i32
    scf.if %2 {
      %cst_21 = arith.constant 0xFF800000 : f32
      %31 = vector.broadcast %cst_21 : f32 to vector<1x1xf32>
      %c0_22 = arith.constant 0 : index
      %c0_23 = arith.constant 0 : index
      %32 = vector.load %arg7[%c0_22, %c0_23] : memref<1x1xf32, #tpu.memory_space<vmem>>, vector<1x1xf32>
      tpu.vector_store %arg7[%c0_22, %c0_23], %31 {strides = array<i32>} : memref<1x1xf32, #tpu.memory_space<vmem>>, vector<1x1xf32>,
      %cst_24 = arith.constant 0.000000e+00 : f32
      %33 = vector.broadcast %cst_24 : f32 to vector<1x1xf32>
      %c0_25 = arith.constant 0 : index
      %c0_26 = arith.constant 0 : index
      %34 = vector.load %arg8[%c0_25, %c0_26] : memref<1x1xf32, #tpu.memory_space<vmem>>, vector<1x1xf32>
      tpu.vector_store %arg8[%c0_25, %c0_26], %33 {strides = array<i32>} : memref<1x1xf32, #tpu.memory_space<vmem>>, vector<1x1xf32>,
      %cst_27 = arith.constant 0.000000e+00 : f32
      %35 = vector.broadcast %cst_27 : f32 to vector<1x32xf32>
      %c0_28 = arith.constant 0 : index
      %c0_29 = arith.constant 0 : index
      %36 = vector.load %arg9[%c0_28, %c0_29] : memref<1x32xf32, #tpu.memory_space<vmem>>, vector<1x32xf32>
      tpu.vector_store %arg9[%c0_28, %c0_29], %35 {strides = array<i32>} : memref<1x32xf32, #tpu.memory_space<vmem>>, vector<1x32xf32>,
    } else {
    }
    %c0 = arith.constant 0 : index
    %c0_1 = arith.constant 0 : index
    %3 = vector.load %arg2[%c0, %c0_1] : memref<32x32xf32, #tpu.memory_space<vmem>>, vector<32x32xf32>
    %c0_2 = arith.constant 0 : index
    %c0_3 = arith.constant 0 : index
    %4 = vector.load %arg3[%c0_2, %c0_3] : memref<32x1xf32, #tpu.memory_space<vmem>>, vector<32x1xf32>
    %cst = arith.constant dense<0.000000e+00> : vector<32x1xf32>
    %5 = tpu.matmul %3, %4, %cst {dimension_numbers = #tpu.dot_dimension_numbers<[1], [0], [0], [1], [0, 0, 1, 1], [], []>} : vector<32x32xf32>, vector<32x1xf32>, vector<32x1xf32> -> vector<32x1xf32>
    %c0_4 = arith.constant 0 : index
    %c0_5 = arith.constant 0 : index
    %6 = vector.load %arg7[%c0_4, %c0_5] : memref<1x1xf32, #tpu.memory_space<vmem>>, vector<1x1xf32>
    %cst_6 = arith.constant dense<0xFF800000> : vector<1xf32>
    %7 = vector.multi_reduction <maximumf>, %5, %cst_6 [0] : vector<32x1xf32> to vector<1xf32>
    %8 = vector.shape_cast %7 : vector<1xf32> to vector<1x1xf32>
    %9 = arith.maximumf %6, %8 : vector<1x1xf32>
    %10 = arith.subf %6, %9 : vector<1x1xf32>
    %11 = math.exp %10 : vector<1x1xf32>
    %12 = vector.broadcast %9 : vector<1x1xf32> to vector<32x1xf32>
    %13 = arith.subf %5, %12 : vector<32x1xf32>
    %14 = math.exp %13 : vector<32x1xf32>
    %c0_7 = arith.constant 0 : index
    %c0_8 = arith.constant 0 : index
    %15 = vector.load %arg8[%c0_7, %c0_8] : memref<1x1xf32, #tpu.memory_space<vmem>>, vector<1x1xf32>
    %16 = arith.mulf %11, %15 : vector<1x1xf32>
    %cst_9 = arith.constant dense<0.000000e+00> : vector<1xf32>
    %17 = vector.multi_reduction <add>, %14, %cst_9 [0] : vector<32x1xf32> to vector<1xf32>
    %18 = vector.shape_cast %17 : vector<1xf32> to vector<1x1xf32>
    %19 = arith.addf %16, %18 : vector<1x1xf32>
    %c0_10 = arith.constant 0 : index
    %c0_11 = arith.constant 0 : index
    %20 = vector.load %arg8[%c0_10, %c0_11] : memref<1x1xf32, #tpu.memory_space<vmem>>, vector<1x1xf32>
    tpu.vector_store %arg8[%c0_10, %c0_11], %19 {strides = array<i32>} : memref<1x1xf32, #tpu.memory_space<vmem>>, vector<1x1xf32>,
    %c0_12 = arith.constant 0 : index
    %c0_13 = arith.constant 0 : index
    %21 = vector.load %arg9[%c0_12, %c0_13] : memref<1x32xf32, #tpu.memory_space<vmem>>, vector<1x32xf32>
    %22 = vector.broadcast %11 : vector<1x1xf32> to vector<1x32xf32>
    %23 = arith.mulf %22, %21 : vector<1x32xf32>
    %cst_14 = arith.constant dense<0.000000e+00> : vector<1x32xf32>
    %24 = tpu.matmul %14, %3, %cst_14 {dimension_numbers = #tpu.dot_dimension_numbers<[0], [0], [1], [1], [0, 1, 1, 1], [], []>} : vector<32x1xf32>, vector<32x32xf32>, vector<1x32xf32> -> vector<1x32xf32>
    %25 = arith.addf %23, %24 : vector<1x32xf32>
    %c0_15 = arith.constant 0 : index
    %c0_16 = arith.constant 0 : index
    %26 = vector.load %arg9[%c0_15, %c0_16] : memref<1x32xf32, #tpu.memory_space<vmem>>, vector<1x32xf32>
    tpu.vector_store %arg9[%c0_15, %c0_16], %25 {strides = array<i32>} : memref<1x32xf32, #tpu.memory_space<vmem>>, vector<1x32xf32>,
    %c0_17 = arith.constant 0 : index
    %c0_18 = arith.constant 0 : index
    %27 = vector.load %arg7[%c0_17, %c0_18] : memref<1x1xf32, #tpu.memory_space<vmem>>, vector<1x1xf32>
    tpu.vector_store %arg7[%c0_17, %c0_18], %9 {strides = array<i32>} : memref<1x1xf32, #tpu.memory_space<vmem>>, vector<1x1xf32>,
    %c0_i32_19 = arith.constant 0 : i32
    %28 = arith.cmpi eq, %arg1, %c0_i32_19 : i32
    %29 = arith.extui %28 : i1 to i32
    %c0_i32_20 = arith.constant 0 : i32
    %30 = arith.cmpi ne, %29, %c0_i32_20 : i32
    scf.if %30 {
      %c0_21 = arith.constant 0 : index
      %c0_22 = arith.constant 0 : index
      %31 = vector.load %arg7[%c0_21, %c0_22] : memref<1x1xf32, #tpu.memory_space<vmem>>, vector<1x1xf32>
      %c0_23 = arith.constant 0 : index
      %c0_24 = arith.constant 0 : index
      %c0_25 = arith.constant 0 : index
      %32 = vector.load %arg4[%c0_23, %c0_24, %c0_25] : memref<1x1x1xf32, #tpu.memory_space<vmem>>, vector<1x1x1xf32>
      %33 = vector.shape_cast %32 : vector<1x1x1xf32> to vector<1x1xf32>
      %34 = vector.shape_cast %31 : vector<1x1xf32> to vector<1x1x1xf32>
      tpu.vector_store %arg4[%c0_23, %c0_24, %c0_25], %34 {strides = array<i32>} : memref<1x1x1xf32, #tpu.memory_space<vmem>>, vector<1x1x1xf32>,
      %c0_26 = arith.constant 0 : index
      %c0_27 = arith.constant 0 : index
      %35 = vector.load %arg8[%c0_26, %c0_27] : memref<1x1xf32, #tpu.memory_space<vmem>>, vector<1x1xf32>
      %c0_28 = arith.constant 0 : index
      %c0_29 = arith.constant 0 : index
      %c0_30 = arith.constant 0 : index
      %36 = vector.load %arg5[%c0_28, %c0_29, %c0_30] : memref<1x1x1xf32, #tpu.memory_space<vmem>>, vector<1x1x1xf32>
      %37 = vector.shape_cast %36 : vector<1x1x1xf32> to vector<1x1xf32>
      %38 = vector.shape_cast %35 : vector<1x1xf32> to vector<1x1x1xf32>
      tpu.vector_store %arg5[%c0_28, %c0_29, %c0_30], %38 {strides = array<i32>} : memref<1x1x1xf32, #tpu.memory_space<vmem>>, vector<1x1x1xf32>,
      %c0_31 = arith.constant 0 : index
      %c0_32 = arith.constant 0 : index
      %39 = vector.load %arg9[%c0_31, %c0_32] : memref<1x32xf32, #tpu.memory_space<vmem>>, vector<1x32xf32>
      %c0_33 = arith.constant 0 : index
      %c0_34 = arith.constant 0 : index
      %c0_35 = arith.constant 0 : index
      %40 = vector.load %arg6[%c0_33, %c0_34, %c0_35] : memref<1x1x32xf32, #tpu.memory_space<vmem>>, vector<1x1x32xf32>
      %41 = vector.shape_cast %40 : vector<1x1x32xf32> to vector<1x32xf32>
      %42 = vector.shape_cast %39 : vector<1x32xf32> to vector<1x1x32xf32>
      tpu.vector_store %arg6[%c0_33, %c0_34, %c0_35], %42 {strides = array<i32>} : memref<1x1x32xf32, #tpu.memory_space<vmem>>, vector<1x1x32xf32>,
    } else {
    }
    return
  }
  func.func @transform_0(%arg0: i32, %arg1: i32) -> (i32, i32) {
    %c1_i32 = arith.constant 1 : i32
    %0 = arith.muli %arg0, %c1_i32 : i32
    %1 = arith.addi %0, %arg1 : i32
    %c0_i32 = arith.constant 0 : i32
    %c0_i32_0 = arith.constant 0 : i32
    return %1, %c0_i32 : i32, i32
  }
  func.func @transform_1(%arg0: i32, %arg1: i32) -> (i32, i32) {
    %c0_i32 = arith.constant 0 : i32
    %c0_i32_0 = arith.constant 0 : i32
    %c0_i32_1 = arith.constant 0 : i32
    return %c0_i32, %c0_i32_0 : i32, i32
  }
  func.func @transform_2(%arg0: i32, %arg1: i32) -> (i32, i32, i32) {
    %c0_i32 = arith.constant 0 : i32
    %c0_i32_0 = arith.constant 0 : i32
    %c0_i32_1 = arith.constant 0 : i32
    return %arg0, %c0_i32, %c0_i32_0 : i32, i32, i32
  }
  func.func @transform_3(%arg0: i32, %arg1: i32) -> (i32, i32, i32) {
    %c0_i32 = arith.constant 0 : i32
    %c0_i32_0 = arith.constant 0 : i32
    %c0_i32_1 = arith.constant 0 : i32
    return %arg0, %c0_i32, %c0_i32_0 : i32, i32, i32
  }
  func.func @transform_4(%arg0: i32, %arg1: i32) -> (i32, i32, i32) {
    %c0_i32 = arith.constant 0 : i32
    %c0_i32_0 = arith.constant 0 : i32
    %c0_i32_1 = arith.constant 0 : i32
    return %arg0, %c0_i32, %c0_i32_0 : i32, i32, i32
  }
}

</mosaic_0001>

<bundles_post_ra>
// kernel: tpu_custom_call.1
= control target key start
LH: loop header
LB: loop body
LE: loop exit
PB: predicated region body
PF: predicated region fallthrough
CT: control target
= control target key end

     0   :  { %10 = vsyncpa [#allocation6], 0  ;;  %s890_s0 = inlined_call_operand.vmem [shape: f32[64,32], index: 0, kind: input, shape index: {}]   ;;  %s891_s1 = inlined_call_operand.vmem [shape: f32[32,1], index: 1, kind: input, shape index: {}]   ;;  %s892_s2 = inlined_call_operand.vmem [shape: f32[2,1,1], index: 2, kind: output, shape index: {0}]   ;;  %s893_s3 = inlined_call_operand.vmem [shape: f32[2,1,1], index: 3, kind: output, shape index: {1}]   ;;  %s894_s4 = inlined_call_operand.hbm [shape: f32[2,1,32], index: 4, kind: output, shape index: {2}]  }
   0x1   :  { %12 = vsyncpa [#allocation6 + $0x1], 0  ;;  %s746_s15 = smov 0   ;;  %s748_s16 = smov 0  }
   0x2   :  { %s750_s17 = smov 0   ;;  %s752_s18 = smov 0  }
   0x3   :  { %s754_s19 = smov 0   ;;  %s756_s20 = smov 0  }
   0x4 LB: > { %s546_s21 = sadd.s32 4294967295, %s716_s20   ;;  %s547_s22 = sadd.s32 4294967294, %s716_s20   ;;  %s716_s20 = sphi %s756_s20, %s18_s20   ;;  %s712_s19 = sphi %s754_s19, %s901_s19   ;;  %s708_s18 = sphi %s752_s18, %s900_s18   ;;  %s704_s17 = sphi %s750_s17, %s899_s17   ;;  %s700_s16 = sphi %s748_s16, %s898_s16   ;;  %s696_s15 = sphi %s746_s15, %s897_s15  }
   0x5   : > { %s30_s23 = sadd.s32 1, %s712_s19  ;;  %s138_s24 = sadd.s32 1, %s704_s17 }
   0x6   : > { %p32_p0 = scmp.ge.s32.totalorder %s30_s23, 2  ;;  %p148_p1 = scmp.ne.s32.totalorder %s704_s17, %s700_s16 }
   0x7   : > { %p149_p2 = scmp.eq.s32.totalorder %s546_s21, 1  ;;  %p154_p3 = scmp.ne.s32.totalorder %s700_s16, %s696_s15 }
   0x8   : > { %s903_s23 = smov (%p32_p0, %s30_s23), 0  ;;  %p155_p5 = scmp.eq.s32.totalorder %s547_s22, 1 }
   0x9   : > { %p786_p4 = por %p149_p2, %p148_p1  ;;  %s135_s26 = ssub.s32 %s712_s19, %s903_s23 }
   0xa   : > { %p550_p6 = scmp.ge.s32.totalorder %s716_s20, 1  ;;  %p136_p7 = scmp.eq.s32.totalorder %s135_s26, 0 }
   0xb   : > { %p793_p8 = por %p155_p5, %p154_p3  ;;  %p187_p9 = scmp.lt.s32.totalorder %s716_s20, 3 }
   0xc   : > { %s799_s28 = scalar_select %p136_p7, %s704_s17, %s138_s24  }
   0xd   : > { %p188_p10 = pnand %p550_p6, %p187_p9 }
   0xe   : > { %s551_s7 = sshll.u32 (!%p188_p10), %s708_s18, 2  ;;  %p227_p12 = scmp.lt.s32.totalorder (!%p188_p10), %s708_s18, 1 }
   0xf   : > { %191 = sbr.rel (%p188_p10) target bundleno = 504 (0x1f8), region = 28  ;;  %p221_p11 = scmp.lt.s32.totalorder (!%p188_p10), %s551_s7, 7 }
  0x10   : > { %s441_s10 = scalar_lea.hbm (!%p188_p10), %s894_s4, %s708_s18 }
  0x11   : > { %s445_s13 = sshll.u32 (!%p188_p10), %s441_s10, 4  ;;  %s446_s13 = int_to_ptr.hbm [resolvable:$true] %s445_s13 }
  0x14   : > { %v249_v0 = vld [vmem:[%s891_s1 + $0x18] sm:$0xff]  ;;  %v248_v1 = vld [vmem:[%s891_s1 + $0x10] sm:$0xff]  ;;  %v247_v2 = vld [vmem:[%s891_s1 + $0x8] sm:$0xff]  ;;  %s905_s7 = smov (!%p221_p11, %s551_s7), 7  ;;  %vm250_vm0 = vcmask 261120   ;;  %vm237_vm1 = vcmask 0  }
  0x15   : > { %561 = vmatpush.msra.mxu3 %v249_v0  ;;  %560 = vmatpush.msra.mxu2 %v249_v0  ;;  %v246_v3 = vld [vmem:[%s891_s1] sm:$0xff]  ;;  %s552_s12 = sshll.u32 %s905_s7, 3  ;;  %v718_v8 = vmov -inf   ;;  %v719_v9 = vmov 0.0   ;;  %vm293_vm2 = vcmask 7168   ;;  %v720_v15 = vmov 0  }
  0x16   : > { %275 = vmatpush.msra.mxu0 %v249_v0  ;;  %s224_s21 = scalar_lea.vmem %s890_s0, %s552_s12  ;;  %238 = vst.msk [vmem:[#allocation2] sm:$0x1] %vm237_vm1, %v718_v8  ;;  %626 = vset.pattern.permute.xlu1 %v720_v15  ;;  %vm240_vm3 = vcmask 253952   ;;  %s217_s7 = sand.u32 1, %s700_s16  }
  0x17   : > { %563 = vmatpush.msra.mxu3 %v248_v1  ;;  %562 = vmatpush.msra.mxu2 %v248_v1  ;;  %v244_v4 = vld [vmem:[%s224_s21 + $0x10] sm:$0xff]  ;;  %v243_v5 = vld [vmem:[%s224_s21 + $0x8] sm:$0xff]  ;;  %v245_v6 = vld [vmem:[%s224_s21 + $0x18] sm:$0xff]  ;;  %239 = vst.msk [vmem:[#allocation3] sm:$0x1] %vm237_vm1, %v719_v9  ;;  %s831_s22 = scalar_select %p227_p12, %s708_s18, 1 }
  0x18   : > { %276 = vmatpush.msra.mxu0 %v248_v1  ;;  %v242_v7 = vld [vmem:[%s224_s21] sm:$0xff]  ;;  %399 = vmatpush.msra.mxu1 %v245_v6  ;;  %241 = vst.msk [vmem:[#allocation4] sm:$0x1] %vm240_vm3, %v719_v9  ;;  %s218_s11 = scalar_lea.vmem [#allocation5], %s217_s7  ;;  %s427_s14 = scalar_lea.sflag [#allocation6], %s217_s7 }
  0x19   : > { %565 = vmatpush.msra.mxu3 %v247_v2  ;;  %564 = vmatpush.msra.mxu2 %v247_v2  ;;  %s229_s29 = scalar_lea.vmem %s892_s2, %s831_s22  ;;  %s232_s6 = scalar_lea.vmem %s893_s3, %s831_s22 }
  0x1a   : > { %277 = vmatpush.msra.mxu0 %v247_v2  ;;  %400 = vmatpush.msra.mxu1 %v244_v4  ;;  %s443_s12 = sshll.u32 %s218_s11, 4  ;;  %s652_s21 = sshra.s32 %s446_s13, 4  ;;  %s444_s12 = int_to_ptr.vmem [resolvable:$true] %s443_s12  ;;  %s653_s21 = int_to_ptr.hbm [resolvable:$true] %s652_s21 }
  0x1b   : > { %567 = vmatpush.msra.mxu3 %v246_v3  ;;  %566 = vmatpush.msra.mxu2 %v246_v3  ;;  %s654_s22 = scalar_lea.hbm %s653_s21, 1  ;;  %s658_s18 = scalar_lea.hbm %s894_s4, 2 }
  0x1c   : > { %555 = vmatmul.msk.f32.vlgmr.msra.gmra.mxu3 %vm250_vm0, %v244_v4  ;;  %554 = vmatmul.msk.f32.vlgmr.msra.gmra.mxu2 %vm250_vm0, %v243_v5  ;;  %p655_p13 = scmp.ne.s32.totalorder %s653_s21, %s654_s22  ;;  %p659_p2 = scmp.lt.s32.totalorder %s653_s21, %s894_s4 }
  0x1d   : > { %278 = vmatpush.msra.mxu0 %v246_v3  ;;  %401 = vmatpush.msra.mxu1 %v243_v5  ;;  %v292_v27 = vld [vmem:[#allocation2] sm:$0x1]  ;;  %p660_p3 = scmp.lt.s32.totalorder %s658_s18, %s654_s22 }
  0x1e   : > { %553 = vmatmul.msk.f32.vlgmr.msra.gmra.mxu0 %vm250_vm0, %v242_v7  ;;  %v326_v58 = vld [vmem:[#allocation3] sm:$0x1]  ;;  %p656_p0 = pnand %p655_p13, %p786_p4 }
  0x1f   : > { %402 = vmatpush.msra.mxu1 %v242_v7  ;;  %v344_v3 = vld [vmem:[#allocation4] sm:$0x1]  ;;  %p661_p5 = por %p660_p3, %p659_p2 }
  0x20   : > { %p657_p1 = pneg %p656_p0 }
  0x22   : > { %p662_p6 = pnand %p661_p5, %p657_p1 }
  0x24   : > { %556 = vmatmul.msk.f32.gmra.mxu3 %vm250_vm0, %v245_v6 }
  0x9b   : > { %v280_v11 = vpop.f32.mrf.mxu0 }
  0x9c   : > { %v294_v13 = vsel %vm293_vm2, %v280_v11, -inf }
  0x9f   : > { %v286_v10 = vpop.f32.mrf.mxu3  ;;  %v283_v12 = vpop.f32.mrf.mxu2 }
  0xa0   : > { %v295_v14 = vsel %vm293_vm2, %v283_v12, -inf  ;;  %v296_v18 = vsel %vm293_vm2, %v286_v10, -inf }
  0xa1   : > { %v298_v16 = vmax.f32 %v294_v13, %v295_v14 }
  0xa7   : > { %v289_v17 = vpop.f32.mrf.mxu3 }
  0xa8   : > { %v297_v19 = vsel %vm293_vm2, %v289_v17, -inf }
  0xa9   : > { %v299_v20 = vmax.f32 %v296_v18, %v297_v19 }
  0xab   : > { %v300_v21 = vmax.f32 %v298_v16, %v299_v20 }
  0xad   : > { %v301_v22 = vrot.slane %v300_v21, 4 }
  0xaf   : > { %v302_v23 = vmax.f32 %v300_v21, %v301_v22 }
  0xb1   : > { %v303_v24 = vrot.slane %v302_v23, 2 }
  0xb3   : > { %v304_v25 = vmax.f32 %v302_v23, %v303_v24 }
  0xb5   : > { %v305_v26 = vrot.slane %v304_v25, 1 }
  0xb7   : > { %v306_v28 = vmax.f32 %v304_v25, %v305_v26 }
  0xb9   : > { %v307_v29 = vmax.f32 %v292_v27, %v306_v28 }
  0xbb   : > { %v312_v30 = vperm.slane %v307_v29, 0  ;;  %410 = vst.msk [vmem:[#allocation2] sm:$0x1] %vm237_vm1, %v307_v29  ;;  %v308_v31 = vsub.f32 %v292_v27, %v307_v29 }
  0xbd   : > { %v317_v32 = vsub.f32 %v289_v17, %v312_v30  ;;  %v309_v33 = vmul.f32 1.442695, %v308_v31  ;;  %v314_v34 = vsub.f32 %v280_v11, %v312_v30  ;;  %v315_v35 = vsub.f32 %v283_v12, %v312_v30 }
  0xbe   : > { %v316_v36 = vsub.f32 %v286_v10, %v312_v30 }
  0xbf   : > { %628 = vpow2.f32 %v309_v33  ;;  %v318_v37 = vmul.f32 1.442695, %v314_v34  ;;  %v320_v38 = vmul.f32 1.442695, %v315_v35  ;;  %v324_v40 = vmul.f32 1.442695, %v317_v32 }
  0xc0   : > { %v322_v39 = vmul.f32 1.442695, %v316_v36 }
  0xc1   : > { %630 = vpow2.f32 %v318_v37 }
  0xc2   : > { %v414_v41 = vld [vmem:[#allocation2] sm:$0x1]  ;;  %632 = vpow2.f32 %v320_v38 }
  0xc3   : > { %415 = vst.msk [vmem:[%s229_s29] sm:$0x1] %vm237_vm1, %v414_v41  ;;  %634 = vpow2.f32 %v322_v39 }
  0xc4   : > { %636 = vpow2.f32 %v324_v40 }
  0xc5   : > { %v629_v42 = vpop.eup %628 }
  0xc6   : > { %347 = vperm.xlu1 %626, %v629_v42   ;;  %v327_v60 = vmul.f32 %v629_v42, %v326_v58 }
  0xc7   : > { %v631_v43 = vpop.eup %630 }
  0xc8   : > { %v633_v44 = vpop.eup %632  ;;  %352 = vxpose.xlu0.b32.start [1/4] (short) (narrow) %v631_v43, 8  ;;  %v328_v45 = vsel %vm293_vm2, %v631_v43, 0.0 }
  0xc9   : > { %v635_v46 = vpop.eup %634  ;;  %v329_v47 = vsel %vm293_vm2, %v633_v44, 0.0 }
  0xca   : > { %v637_v48 = vpop.eup %636  ;;  %v330_v49 = vadd.f32 %v329_v47, %v328_v45  ;;  %v331_v50 = vsel %vm293_vm2, %v635_v46, 0.0 }
  0xcb   : > { %v333_v52 = vsel %vm293_vm2, %v637_v48, 0.0 }
  0xcc   : > { %v332_v51 = vadd.f32 %v331_v50, %v330_v49 }
  0xce   : > { %v334_v53 = vadd.f32 %v333_v52, %v332_v51 }
  0xd0   : > { %353 = vxpose.xlu0.b32.cont [2/4] (short) (narrow) %v633_v44, 8  ;;  %v335_v54 = vrot.slane %v334_v53, 4 }
  0xd2   : > { %v336_v55 = vadd.f32 %v335_v54, %v334_v53 }
  0xd4   : > { %v337_v56 = vrot.slane %v336_v55, 2 }
  0xd6   : > { %v338_v57 = vadd.f32 %v337_v56, %v336_v55 }
  0xd8   : > { %354 = vxpose.xlu0.b32.cont [3/4] (short) (narrow) %v635_v46, 8  ;;  %v339_v59 = vrot.slane %v338_v57, 1 }
  0xda   : > { %v340_v61 = vadd.f32 %v339_v59, %v338_v57 }
  0xdc   : > { %v341_v62 = vadd.f32 %v340_v61, %v327_v60 }
  0xde   : > { %343 = vst.msk [vmem:[#allocation3] sm:$0x1] %vm237_vm1, %v341_v62 }
  0xe0   : > { %355 = vxpose.xlu0.b32.end [4/4] (short) (narrow) %v637_v48, 8 }
  0xe5   : > { %v416_v63 = vld [vmem:[#allocation3] sm:$0x1] }
  0xe6   : > { %417 = vst.msk [vmem:[%s232_s6] sm:$0x1] %vm237_vm1, %v416_v63 }
 0x138   : > { %v348_v1 = vpop.permute.xlu1 %347 }
 0x139   : > { %v350_v2 = vperm.slane %v348_v1, 0 }
 0x13b   : > { %v351_v4 = vmul.f32 %v350_v2, %v344_v3 }
 0x147   : > { %627 = vset.pattern.permute.xlu0 %v720_v15 }
 0x16c   : > { %v368_v0 = vpop.trf.xlu0 }
 0x16d   : > { %557 = vmatmul.msk.f32.vlgmr.msra.gmra.mxu1 %vm250_vm0, %v368_v0 }
 0x1ea   : > { %v404_v5 = vpop.f32.mrf.mxu1 }
 0x1eb   : > { %v407_v6 = vadd.f32 %v404_v5, %v351_v4 }
 0x1ed   : > { %409 = vst.msk [vmem:[#allocation4] sm:$0x1] %vm240_vm3, %v407_v6 }
 0x1f4   : > { %v418_v7 = vld [vmem:[#allocation4] sm:$0x1] }
 0x1f5   : > { %419 = vst.msk [vmem:[%s218_s11] sm:$0x1] %vm240_vm3, %v418_v7 }
 0x1f6   : > { %665 = shalt.err (!%p662_p6)
}
 0x1f7   : > { %568 = dma.vmem_to_hbm [thread:$0]  (%p786_p4), %s444_s12, 16, %s446_s13, %s427_s14  }
 0x1f8 PF: > { %p574_p7 = scmp.ge.s32.totalorder %s716_s20, 2  ;;  %s469_s5 = sand.u32 1, %s696_s15  }
 0x1f9   : > { %s470_s6 = scalar_lea.sflag [#allocation6], %s469_s5 }
 0x1fa   : > { %p571_p9 = pnand %p574_p7, %p793_p8 }
 0x1fc   : > { %p572_p10 = pneg %p571_p9 }
 0x1fe   : > { %691 = dma.done.wait (%p572_p10), %s470_s6, 16  }
 0x1ff   : > { %693 = vsyncadd (%p572_p10), %s470_s6, 4294967280  ;;  %s18_s20 = sadd.s32 1, %s716_s20   ;;  %s897_s15 = smov %s700_s16 }
 0x200   : > { %p15_p11 = scmp.ge.s32.totalorder %s18_s20, 4   ;;  %s898_s16 = smov %s704_s17 }
 0x201   : > { %s899_s17 = smov %s799_s28  ;;  %s900_s18 = smov %s712_s19 }
 0x202   : > { %s901_s19 = smov %s903_s23  ;;  %17 = sbr.rel (!%p15_p11) target bundleno = 4 (0x4), region = 95 }
 0x207   :  { %475 = vsyncpa [#allocation6], 1 }
 0x208   :  { %477 = vsyncpa [#allocation6 + $0x1], 1 }

</bundles_post_ra>
